<compile_context>
chip_gen: v7x
topology: tpu7x:2x2x1
jax: 0.10.0
libtpu: 0.0.40
codegen_flags: <defaults>
</compile_context>

<pallas_src>
import functools

import jax
import jax.numpy as jnp
from jax.experimental import pallas as pl
from jax.experimental.pallas import tpu as pltpu


# ----------------------------------------------------------------------------
# Config (stands in for cfg.FAST_RCNN.*) — small, deterministic shapes.
# ----------------------------------------------------------------------------
MLP_HEAD_DIM = 128          # cfg.FAST_RCNN.MLP_HEAD_DIM (hidden_dim)
ROI_XFORM_RESOLUTION = 8    # cfg.FAST_RCNN.ROI_XFORM_RESOLUTION
IN_CHANNELS = 4
SPATIAL_SCALE = 0.25
NUM_IMAGES = 2
FEAT_HW = 16
NUM_ROIS = 8                # batch of ROIs fed to the MLP head

ROI_TILE = 128              # M tile: full MXU row height; ROIs padded up to it
LANE = 128                  # lane width / minimum last-dim multiple
W1_RESIDENT_BYTES = 28 << 20  # keep W1 fully resident in VMEM below this size
K_TILE = 2048               # reduction tile when W1 must be streamed


def _round_up(n, m):
    return ((n + m - 1) // m) * m


# ----------------------------------------------------------------------------
# Kernel A (resident W1): one grid axis over M. Whole MLP fused in one step.
#   X:(TM, K) bf16, W1:(K, H) bf16, W2:(H, H) bf16, b1/b2:(8, H) f32.
# ----------------------------------------------------------------------------
def _box_head_mlp_resident_kernel(x_ref, w1_ref, b1_ref, w2_ref, b2_ref, o_ref,
                                  *, use_relu):
    h = jnp.dot(x_ref[...], w1_ref[...], preferred_element_type=jnp.float32)
    h = jnp.maximum(h + b1_ref[0:1, :], 0.0)                    # f32 VPU
    y = jnp.dot(h.astype(jnp.bfloat16), w2_ref[...],
                preferred_element_type=jnp.float32)
    y = y + b2_ref[0:1, :]
    if use_relu:                                                # static bool
        y = jnp.maximum(y, 0.0)
    o_ref[...] = y.astype(o_ref.dtype)


# ----------------------------------------------------------------------------
# Kernel B (tiled K): grid = (M tiles, K tiles). The f32 output block itself
# is the fc1 accumulator (constant (i, 0) index across k). b1 is folded into
# the k==0 init; the epilogue (ReLU + fc2 + bias [+ ReLU]) runs at the last k.
# ----------------------------------------------------------------------------
def _box_head_mlp_tiled_kernel(x_ref, w1_ref, b1_ref, w2_ref, b2_ref, o_ref,
                               *, use_relu):
    k = pl.program_id(1)

    @pl.when(k == 0)
    def _():
        # init accumulator with the broadcast bias (folds b1 into the init)
        o_ref[...] = jnp.broadcast_to(b1_ref[0:1, :], o_ref.shape)

    o_ref[...] += jnp.dot(x_ref[...], w1_ref[...],
                          preferred_element_type=jnp.float32)

    @pl.when(k == pl.num_programs(1) - 1)
    def _():
        h = jnp.maximum(o_ref[...], 0.0)                        # bias already in
        y = jnp.dot(h.astype(jnp.bfloat16), w2_ref[...],
                    preferred_element_type=jnp.float32)
        y = y + b2_ref[0:1, :]
        if use_relu:
            y = jnp.maximum(y, 0.0)
        o_ref[...] = y.astype(o_ref.dtype)


def box_head_mlp(x_flat, w1, b1, w2, b2, *, use_relu=True):
    """x_flat: (B, K); w1: (K, H); w2: (H, H); b1/b2: (1, H). Returns (B, H) f32."""
    B, K = x_flat.shape
    H = w1.shape[1]

    # Pad to MXU/lane-friendly shapes. Zero-padded rows/cols are numerically
    # inert through the matmuls and the padded outputs are sliced off below.
    B_pad = _round_up(max(B, 1), ROI_TILE)
    H_pad = _round_up(H, LANE)
    K_pad = _round_up(K, LANE)

    w1_resident = (K_pad * H_pad * 2) <= W1_RESIDENT_BYTES
    if w1_resident:
        kt = K_pad
    else:
        kt = K_TILE
        K_pad = _round_up(K, kt)

    # bf16 before padding -> single pass over the padded activation buffer.
    x_p = jnp.pad(x_flat.astype(jnp.bfloat16),
                  ((0, B_pad - B), (0, K_pad - K)))
    w1_p = jnp.pad(w1.astype(jnp.bfloat16), ((0, K_pad - K), (0, H_pad - H)))
    w2_p = jnp.pad(w2.astype(jnp.bfloat16), ((0, H_pad - H), (0, H_pad - H)))

    def pad_bias(b):
        b = jnp.pad(b.reshape(1, -1).astype(jnp.float32),
                    ((0, 0), (0, H_pad - H)))
        return jnp.broadcast_to(b, (8, H_pad))       # full 8-sublane tile

    b1_p = pad_bias(b1)
    b2_p = pad_bias(b2)

    # Explicit VMEM budget (double-buffered streams, single-buffered residents,
    # double-buffered output). Capped at 64 MiB so the plan stays valid on v7x.
    x_tile_b = ROI_TILE * kt * 2
    w1_b = kt * H_pad * 2
    w2_b = H_pad * H_pad * 2
    bias_b = 2 * 8 * H_pad * 4
    out_b = ROI_TILE * H_pad * 4
    if w1_resident:
        est = 2 * x_tile_b + w1_b + w2_b + bias_b + 2 * out_b
    else:
        est = 2 * x_tile_b + 2 * w1_b + w2_b + bias_b + 2 * out_b
    vmem_limit = int(min(max(est + (8 << 20), 32 << 20), 64 << 20))

    kernel_kwargs = dict(use_relu=use_relu)

    if w1_resident:
        kernel = functools.partial(_box_head_mlp_resident_kernel, **kernel_kwargs)
        out = pl.pallas_call(
            kernel,
            out_shape=jax.ShapeDtypeStruct((B_pad, H_pad), jnp.float32),
            grid_spec=pltpu.PrefetchScalarGridSpec(
                num_scalar_prefetch=0,
                grid=(B_pad // ROI_TILE,),
                in_specs=[
                    # activations: move with i — default double-buffering
                    pl.BlockSpec((ROI_TILE, K_pad), lambda i: (i, 0)),
                    # resident operands (constant index): single-buffer
                    pl.BlockSpec((K_pad, H_pad), lambda i: (0, 0),
                                 pipeline_mode=pl.Buffered(1)),   # W1
                    pl.BlockSpec((8, H_pad), lambda i: (0, 0),
                                 pipeline_mode=pl.Buffered(1)),   # b1
                    pl.BlockSpec((H_pad, H_pad), lambda i: (0, 0),
                                 pipeline_mode=pl.Buffered(1)),   # W2
                    pl.BlockSpec((8, H_pad), lambda i: (0, 0),
                                 pipeline_mode=pl.Buffered(1)),   # b2
                ],
                out_specs=pl.BlockSpec((ROI_TILE, H_pad), lambda i: (i, 0)),
            ),
            compiler_params=pltpu.CompilerParams(
                dimension_semantics=("parallel",),
                vmem_limit_bytes=vmem_limit),
        )(x_p, w1_p, b1_p, w2_p, b2_p)
    else:
        kernel = functools.partial(_box_head_mlp_tiled_kernel, **kernel_kwargs)
        out = pl.pallas_call(
            kernel,
            out_shape=jax.ShapeDtypeStruct((B_pad, H_pad), jnp.float32),
            grid_spec=pltpu.PrefetchScalarGridSpec(
                num_scalar_prefetch=0,
                grid=(B_pad // ROI_TILE, K_pad // kt),
                in_specs=[
                    # activations: move with (i, k) — default double-buffering
                    pl.BlockSpec((ROI_TILE, kt), lambda i, k: (i, k)),
                    # fc1 weight stream: moves with k — default double-buffering
                    # (TODO(synk): pl.Buffered(3) if the W1 DMA is exposed on v5e)
                    pl.BlockSpec((kt, H_pad), lambda i, k: (k, 0)),
                    # resident operands (constant index): single-buffer
                    pl.BlockSpec((8, H_pad), lambda i, k: (0, 0),
                                 pipeline_mode=pl.Buffered(1)),   # b1
                    pl.BlockSpec((H_pad, H_pad), lambda i, k: (0, 0),
                                 pipeline_mode=pl.Buffered(1)),   # W2
                    pl.BlockSpec((8, H_pad), lambda i, k: (0, 0),
                                 pipeline_mode=pl.Buffered(1)),   # b2
                ],
                out_specs=pl.BlockSpec((ROI_TILE, H_pad), lambda i, k: (i, 0)),
            ),
            compiler_params=pltpu.CompilerParams(
                dimension_semantics=("parallel", "arbitrary"),
                vmem_limit_bytes=vmem_limit),
        )(x_p, w1_p, b1_p, w2_p, b2_p)

    return out[:B, :H]


# ----------------------------------------------------------------------------
# Glue: a simple roi_xform (stand-in for the injected RoIAlign dependency)
# ----------------------------------------------------------------------------
# TODO(synk): exact cfg.FAST_RCNN.ROI_XFORM_METHOD (RoIAlign, bilinear sampling
# with sampling_ratio) is an externally injected function; here we use a
# deterministic nearest-neighbor crop-resize in plain JAX as the roi2map glue.
def simple_roi_xform(x, rois, *, resolution, spatial_scale):
    # x: (N, C, Hf, Wf) NCHW feature map; rois: (R, 5) [batch_idx, x1, y1, x2, y2]
    N, C, Hf, Wf = x.shape

    def one_roi(roi):
        b = roi[0].astype(jnp.int32)
        x1, y1 = roi[1] * spatial_scale, roi[2] * spatial_scale
        x2, y2 = roi[3] * spatial_scale, roi[4] * spatial_scale
        ys = y1 + (jnp.arange(resolution, dtype=jnp.float32) + 0.5) * (y2 - y1) / resolution
        xs = x1 + (jnp.arange(resolution, dtype=jnp.float32) + 0.5) * (x2 - x1) / resolution
        yi = jnp.clip(jnp.round(ys).astype(jnp.int32), 0, Hf - 1)
        xi = jnp.clip(jnp.round(xs).astype(jnp.int32), 0, Wf - 1)
        feat = x[b]                                   # (C, Hf, Wf)
        return feat[:, yi[:, None], xi[None, :]]      # (C, R, R)

    return jax.vmap(one_roi)(rois)                    # (num_rois, C, R, R)


# ----------------------------------------------------------------------------
# Box_Head_3D module equivalent
# ----------------------------------------------------------------------------
class BoxHead3D:
    def __init__(self, in_channels, roi_xform_func, spatial_scale, key):
        self.dim_in = in_channels
        self.roi_xform = roi_xform_func
        self.spatial_scale = spatial_scale
        self.dim_out = hidden_dim = MLP_HEAD_DIM
        roi_size = ROI_XFORM_RESOLUTION
        k_in = in_channels * roi_size ** 2

        k1, k2 = jax.random.split(key)
        # XavierFill (Glorot uniform), bias = 0. Stored as (in, out) = torch W^T.
        # Weights kept in bf16 once (MXU-native input); biases in f32.
        lim1 = (6.0 / (k_in + hidden_dim)) ** 0.5
        lim2 = (6.0 / (hidden_dim + hidden_dim)) ** 0.5
        self.w1 = jax.random.uniform(k1, (k_in, hidden_dim), jnp.float32,
                                     -lim1, lim1).astype(jnp.bfloat16)
        self.b1 = jnp.zeros((1, hidden_dim), jnp.float32)
        self.w2 = jax.random.uniform(k2, (hidden_dim, hidden_dim), jnp.float32,
                                     -lim2, lim2).astype(jnp.bfloat16)
        self.b2 = jnp.zeros((1, hidden_dim), jnp.float32)

    def roi2map(self, x, rpn_ret, rois_name='rois'):
        rois = rpn_ret[rois_name]
        return self.roi_xform(x, rois,
                              resolution=ROI_XFORM_RESOLUTION,
                              spatial_scale=self.spatial_scale)

    def map2vec(self, x, use_relu=True):
        # handles 4-D (R, C, r, r) and 5-D (N, T, C, r, r) pooled maps
        if x.ndim <= 4:
            batch_size = x.shape[0]
        else:
            batch_size = x.shape[0] * x.shape[1]
        x_flat = x.reshape(batch_size, -1)
        return box_head_mlp(x_flat, self.w1, self.b1, self.w2, self.b2,
                            use_relu=use_relu)

    def forward(self, x, rpn_ret, rois_name='rois', use_relu=True):
        y = self.roi2map(x, rpn_ret, rois_name=rois_name)
        return self.map2vec(y, use_relu=use_relu)


# ----------------------------------------------------------------------------
# Main
# ----------------------------------------------------------------------------
if __name__ == "__main__":
    key = jax.random.PRNGKey(0)
    k_feat, k_roi, k_param = jax.random.split(key, 3)

    # Feature map: NCHW, and a set of ROIs [batch_idx, x1, y1, x2, y2]
    x = jax.random.normal(k_feat, (NUM_IMAGES, IN_CHANNELS, FEAT_HW, FEAT_HW),
                          dtype=jnp.float32)
    img_size = FEAT_HW / SPATIAL_SCALE  # image-space coords
    corners = jax.random.uniform(k_roi, (NUM_ROIS, 4), jnp.float32,
                                 0.0, img_size * 0.5)
    batch_idx = (jnp.arange(NUM_ROIS) % NUM_IMAGES).astype(jnp.float32)[:, None]
    rois = jnp.concatenate(
        [batch_idx, corners[:, :2], corners[:, :2] + corners[:, 2:] + 8.0], axis=1)
    rpn_ret = {'rois': rois}

    head = BoxHead3D(IN_CHANNELS, simple_roi_xform, SPATIAL_SCALE, k_param)

    out = head.forward(x, rpn_ret, rois_name='rois', use_relu=True)
    out = jax.block_until_ready(out)

    # Sanity check against a plain-JAX reference of map2vec that applies the
    # same bf16 rounding of activations/weights (f32 accumulation).
    pooled = head.roi2map(x, rpn_ret)
    xf = pooled.reshape(NUM_ROIS, -1).astype(jnp.float32)
    xb = xf.astype(jnp.bfloat16).astype(jnp.float32)
    w1f = head.w1.astype(jnp.float32)
    w2f = head.w2.astype(jnp.float32)
    h_ref = jnp.maximum(xb @ w1f + head.b1, 0.0)
    hb = h_ref.astype(jnp.bfloat16).astype(jnp.float32)
    ref = jnp.maximum(hb @ w2f + head.b2, 0.0)

    assert out.shape == (NUM_ROIS, MLP_HEAD_DIM)
    assert jnp.allclose(out, ref, atol=2e-2, rtol=2e-2)

    print("KERNEL_OK")
</pallas_src>

<mosaic_0001>
module attributes {stable_mosaic.version = 11 : i64} {
  func.func @_box_head_mlp_resident_kernel(%arg0: i32, %arg1: memref<128x256xbf16, #tpu.memory_space<vmem>>, %arg2: memref<256x128xbf16, #tpu.memory_space<vmem>>, %arg3: memref<8x128xf32, #tpu.memory_space<vmem>>, %arg4: memref<128x128xbf16, #tpu.memory_space<vmem>>, %arg5: memref<8x128xf32, #tpu.memory_space<vmem>>, %arg6: memref<128x128xf32, #tpu.memory_space<vmem>>) attributes {dimension_semantics = [#tpu.dimension_semantics<parallel>], iteration_bounds = array<i64: 1>, scalar_prefetch = 0 : i64, scratch_operands = 0 : i64, tpu.core_type = #tpu.core_type<tc>, window_params = [{transform_indices = @transform_0, window_bounds = array<i64: 128, 256>}, {pipeline_mode = #tpu.pipeline_mode<synchronous>, transform_indices = @transform_1, window_bounds = array<i64: 256, 128>}, {pipeline_mode = #tpu.pipeline_mode<synchronous>, transform_indices = @transform_2, window_bounds = array<i64: 8, 128>}, {pipeline_mode = #tpu.pipeline_mode<synchronous>, transform_indices = @transform_3, window_bounds = array<i64: 128, 128>}, {pipeline_mode = #tpu.pipeline_mode<synchronous>, transform_indices = @transform_4, window_bounds = array<i64: 8, 128>}, {transform_indices = @transform_5, window_bounds = array<i64: 128, 128>}]} {
    %c0 = arith.constant 0 : index
    %c0_0 = arith.constant 0 : index
    %0 = vector.load %arg1[%c0, %c0_0] : memref<128x256xbf16, #tpu.memory_space<vmem>>, vector<128x256xbf16>
    %c0_1 = arith.constant 0 : index
    %c0_2 = arith.constant 0 : index
    %1 = vector.load %arg2[%c0_1, %c0_2] : memref<256x128xbf16, #tpu.memory_space<vmem>>, vector<256x128xbf16>
    %cst = arith.constant dense<0.000000e+00> : vector<128x128xf32>
    %2 = tpu.matmul %0, %1, %cst {dimension_numbers = #tpu.dot_dimension_numbers<[1], [0], [0], [1], [0, 0, 1, 1], [], []>} : vector<128x256xbf16>, vector<256x128xbf16>, vector<128x128xf32> -> vector<128x128xf32>
    %c0_3 = arith.constant 0 : index
    %c0_4 = arith.constant 0 : index
    %3 = vector.load %arg3[%c0_3, %c0_4] : memref<8x128xf32, #tpu.memory_space<vmem>>, vector<1x128xf32>
    %4 = vector.broadcast %3 : vector<1x128xf32> to vector<128x128xf32>
    %5 = arith.addf %2, %4 : vector<128x128xf32>
    %cst_5 = arith.constant 0.000000e+00 : f32
    %6 = vector.broadcast %cst_5 : f32 to vector<128x128xf32>
    %7 = arith.maximumf %5, %6 : vector<128x128xf32>
    %8 = arith.truncf %7 : vector<128x128xf32> to vector<128x128xbf16>
    %c0_6 = arith.constant 0 : index
    %c0_7 = arith.constant 0 : index
    %9 = vector.load %arg4[%c0_6, %c0_7] : memref<128x128xbf16, #tpu.memory_space<vmem>>, vector<128x128xbf16>
    %cst_8 = arith.constant dense<0.000000e+00> : vector<128x128xf32>
    %10 = tpu.matmul %8, %9, %cst_8 {dimension_numbers = #tpu.dot_dimension_numbers<[1], [0], [0], [1], [0, 0, 1, 1], [], []>} : vector<128x128xbf16>, vector<128x128xbf16>, vector<128x128xf32> -> vector<128x128xf32>
    %c0_9 = arith.constant 0 : index
    %c0_10 = arith.constant 0 : index
    %11 = vector.load %arg5[%c0_9, %c0_10] : memref<8x128xf32, #tpu.memory_space<vmem>>, vector<1x128xf32>
    %12 = vector.broadcast %11 : vector<1x128xf32> to vector<128x128xf32>
    %13 = arith.addf %10, %12 : vector<128x128xf32>
    %cst_11 = arith.constant 0.000000e+00 : f32
    %14 = vector.broadcast %cst_11 : f32 to vector<128x128xf32>
    %15 = arith.maximumf %13, %14 : vector<128x128xf32>
    %c0_12 = arith.constant 0 : index
    %c0_13 = arith.constant 0 : index
    %16 = vector.load %arg6[%c0_12, %c0_13] : memref<128x128xf32, #tpu.memory_space<vmem>>, vector<128x128xf32>
    tpu.vector_store %arg6[%c0_12, %c0_13], %15 {strides = array<i32>} : memref<128x128xf32, #tpu.memory_space<vmem>>, vector<128x128xf32>,
    return
  }
  func.func @transform_0(%arg0: i32) -> (i32, i32) {
    %c0_i32 = arith.constant 0 : i32
    %c0_i32_0 = arith.constant 0 : i32
    return %arg0, %c0_i32 : i32, i32
  }
  func.func @transform_1(%arg0: i32) -> (i32, i32) {
    %c0_i32 = arith.constant 0 : i32
    %c0_i32_0 = arith.constant 0 : i32
    %c0_i32_1 = arith.constant 0 : i32
    return %c0_i32, %c0_i32_0 : i32, i32
  }
  func.func @transform_2(%arg0: i32) -> (i32, i32) {
    %c0_i32 = arith.constant 0 : i32
    %c0_i32_0 = arith.constant 0 : i32
    %c0_i32_1 = arith.constant 0 : i32
    return %c0_i32, %c0_i32_0 : i32, i32
  }
  func.func @transform_3(%arg0: i32) -> (i32, i32) {
    %c0_i32 = arith.constant 0 : i32
    %c0_i32_0 = arith.constant 0 : i32
    %c0_i32_1 = arith.constant 0 : i32
    return %c0_i32, %c0_i32_0 : i32, i32
  }
  func.func @transform_4(%arg0: i32) -> (i32, i32) {
    %c0_i32 = arith.constant 0 : i32
    %c0_i32_0 = arith.constant 0 : i32
    %c0_i32_1 = arith.constant 0 : i32
    return %c0_i32, %c0_i32_0 : i32, i32
  }
  func.func @transform_5(%arg0: i32) -> (i32, i32) {
    %c0_i32 = arith.constant 0 : i32
    %c0_i32_0 = arith.constant 0 : i32
    return %arg0, %c0_i32 : i32, i32
  }
}

</mosaic_0001>

<bundles_post_ra>
// kernel: tpu_custom_call.1
= control target key start
LH: loop header
LB: loop body
LE: loop exit
PB: predicated region body
PF: predicated region fallthrough
CT: control target
= control target key end

     0   :  { %10 = vsyncpa [#allocation3], 0  ;;  %s1110_s0 = inlined_call_operand.hbm [shape: bf16[128,256], index: 0, kind: input, shape index: {}]   ;;  %s1111_s1 = inlined_call_operand.hbm [shape: bf16[256,128], index: 1, kind: input, shape index: {}]   ;;  %s1112_s2 = inlined_call_operand.hbm [shape: f32[8,128], index: 2, kind: input, shape index: {}]   ;;  %s1113_s3 = inlined_call_operand.hbm [shape: bf16[128,128], index: 3, kind: input, shape index: {}]   ;;  %s1114_s4 = inlined_call_operand.vmem [shape: f32[8,128], index: 4, kind: input, shape index: {}]   ;;  %s1115_s5 = inlined_call_operand.hbm [shape: f32[128,128], index: 5, kind: output, shape index: {}]  }
   0x1   :  { %11 = vsyncpa [#allocation6], 0 }
   0x2   :  { %12 = vsyncpa [#allocation9], 0 }
   0x3   :  { %13 = vsyncpa [#allocation4], 0  ;;  %s971_s18 = smov [#allocation5]   ;;  %s853_s22 = scalar_lea.hbm %s1111_s1, 2048 }
   0x4   :  { %s31_s19 = sshll.u32 %s971_s18, 4  ;;  %p854_p0 = scmp.ne.s32.totalorder %s1111_s1, %s853_s22  ;;  %s32_s19 = int_to_ptr.vmem [resolvable:$true] %s31_s19 }
   0x5   :  { %p857_p1 = scmp.lt.u32.totalorder %s853_s22, %s1111_s1 }
   0x7   :  { %p859_p2 = pnand %p857_p1, %p854_p0 }
   0x9   :  { %862 = shalt.err (!%p859_p2)
}
   0xa   :  { %s863_s27 = scalar_lea.vmem %s32_s19, 2048  ;;  %p868_p4 = scmp.lt.s32.totalorder %s32_s19, %s32_s19 }
   0xb   :  { %p864_p3 = scmp.ne.s32.totalorder %s32_s19, %s863_s27  ;;  %p869_p5 = scmp.lt.s32.totalorder %s863_s27, %s863_s27 }
   0xd   :  { %p870_p6 = por %p869_p5, %p868_p4 }
   0xf   :  { %p871_p7 = pnand %p870_p6, %p864_p3 }
  0x11   :  { %874 = shalt.err (!%p871_p7)
}
  0x12   :  { %s972_s28 = smov 64   ;;  %s973_s29 = smov 4  }
  0x13   :  { %37 = dma.hbm_to_vmem [thread:$0]  %s1111_s1, 2048, %s32_s19, [#allocation6], %s972_s28, %s972_s28, %s973_s29  }
  0x14   :  { %s974_s7 = smov [#allocation2]   ;;  %s875_s11 = scalar_lea.hbm %s1110_s0, 2048 }
  0x15   :  { %s19_s8 = sshll.u32 %s974_s7, 4  ;;  %p876_p8 = scmp.ne.s32.totalorder %s1110_s0, %s875_s11  ;;  %s20_s8 = int_to_ptr.vmem [resolvable:$true] %s19_s8 }
  0x16   :  { %p879_p9 = scmp.lt.u32.totalorder %s875_s11, %s1110_s0 }
  0x18   :  { %p881_p10 = pnand %p879_p9, %p876_p8 }
  0x1a   :  { %884 = shalt.err (!%p881_p10)
}
  0x1b   :  { %s885_s16 = scalar_lea.vmem %s20_s8, 2048  ;;  %p890_p12 = scmp.lt.s32.totalorder %s20_s8, %s20_s8 }
  0x1c   :  { %p886_p11 = scmp.ne.s32.totalorder %s20_s8, %s885_s16  ;;  %p891_p13 = scmp.lt.s32.totalorder %s885_s16, %s885_s16 }
  0x1e   :  { %p892_p0 = por %p891_p13, %p890_p12 }
  0x20   :  { %p893_p1 = pnand %p892_p0, %p886_p11 }
  0x22   :  { %896 = shalt.err (!%p893_p1)
}
  0x23   :  { %s975_s1 = smov 128   ;;  %s976_s17 = smov 8  }
  0x24   :  { %25 = dma.hbm_to_vmem [thread:$0]  %s1110_s0, 2048, %s20_s8, [#allocation3], %s975_s1, %s975_s1, %s976_s17  }
  0x25   :  { %s977_s20 = smov [#allocation7]   ;;  %s978_s22 = smov [#allocation8]  }
  0x26   :  { %s44_s21 = sshll.u32 %s977_s20, 4  ;;  %s53_s23 = sshll.u32 %s978_s22, 4  ;;  %s45_s21 = int_to_ptr.vmem [resolvable:$true] %s44_s21  ;;  %s1040_s23 = int_to_ptr.vmem [resolvable:$true] %s53_s23 }
  0x27   :  { %s897_s26 = scalar_lea.hbm %s1112_s2, 128 }
  0x28   :  { %p898_p2 = scmp.ne.s32.totalorder %s1112_s2, %s897_s26  ;;  %p901_p3 = scmp.lt.u32.totalorder %s897_s26, %s1112_s2 }
  0x2a   :  { %p903_p4 = pnand %p901_p3, %p898_p2 }
  0x2c   :  { %906 = shalt.err (!%p903_p4)
}
  0x2d   :  { %s907_s0 = scalar_lea.vmem %s45_s21, 128  ;;  %p912_p6 = scmp.lt.s32.totalorder %s45_s21, %s45_s21 }
  0x2e   :  { %p908_p5 = scmp.ne.s32.totalorder %s45_s21, %s907_s0  ;;  %p913_p7 = scmp.lt.s32.totalorder %s907_s0, %s907_s0 }
  0x30   :  { %p914_p8 = por %p913_p7, %p912_p6 }
  0x32   :  { %p915_p9 = pnand %p914_p8, %p908_p5 }
  0x34   :  { %918 = shalt.err (!%p915_p9)
}
  0x35   :  { %47 = dma.hbm_to_vmem [thread:$0]  %s1112_s2, 128, %s45_s21, [#allocation6]  }
  0x36   :  { %s919_s12 = scalar_lea.hbm %s1113_s3, 1024 }
  0x37   :  { %p920_p10 = scmp.ne.s32.totalorder %s1113_s3, %s919_s12  ;;  %p923_p11 = scmp.lt.u32.totalorder %s919_s12, %s1113_s3 }
  0x39   :  { %p925_p12 = pnand %p923_p11, %p920_p10 }
  0x3b   :  { %928 = shalt.err (!%p925_p12)
}
  0x3c   :  { %s929_s18 = scalar_lea.vmem %s1040_s23, 1024  ;;  %p934_p0 = scmp.lt.s32.totalorder %s1040_s23, %s1040_s23 }
  0x3d   :  { %p930_p13 = scmp.ne.s32.totalorder %s1040_s23, %s929_s18  ;;  %p935_p1 = scmp.lt.s32.totalorder %s929_s18, %s929_s18 }
  0x3f   :  { %p936_p2 = por %p935_p1, %p934_p0 }
  0x41   :  { %p937_p3 = pnand %p936_p2, %p930_p13 }
  0x43   :  { %940 = shalt.err (!%p937_p3)
}
  0x44   :  { %59 = dma.hbm_to_vmem [thread:$0]  %s1113_s3, 1024, %s1040_s23, [#allocation9], %s972_s28, %s972_s28, %s973_s29  }
  0x45   :  { %963 = dma.done.wait [#allocation3], 2048  }
  0x46   :  { %964 = vsyncadd [#allocation3], 4294965248 }
  0x47   :  { %965 = dma.done.wait [#allocation6], 2176  }
  0x48   :  { %966 = vsyncadd [#allocation6], 4294965120 }
  0x49   :  { %967 = dma.done.wait [#allocation9], 1024  }
  0x4a   :  { %968 = vsyncadd [#allocation9], 4294966272  ;;  %v805_v0 = vld [vmem:[#allocation5 + $0x40] sm:$0xff]   ;;  %v807_v2 = vld [vmem:[#allocation5 + $0x48] sm:$0xff]  }
  0x4b   :  { %v806_v1 = vld [vmem:[#allocation5] sm:$0xff]   ;;  %684 = vmatprep.subr.bf16.mxu0 %v805_v0  ;;  %v808_v3 = vld [vmem:[#allocation5 + $0x8] sm:$0xff]   ;;  %v809_v4 = vld [vmem:[#allocation5 + $0x50] sm:$0xff]  }
  0x4c   :  { %685 = vmatpush3.bf16.msra.mxu0 %v806_v1  ;;  %v810_v5 = vld [vmem:[#allocation5 + $0x10] sm:$0xff]   ;;  %v811_v6 = vld [vmem:[#allocation5 + $0x58] sm:$0xff]   ;;  %v813_v8 = vld [vmem:[#allocation5 + $0x60] sm:$0xff]  }
  0x4d   :  { %686 = vmatprep.subr.bf16.mxu0 %v807_v2  ;;  %v812_v7 = vld [vmem:[#allocation5 + $0x18] sm:$0xff]   ;;  %v814_v9 = vld [vmem:[#allocation5 + $0x20] sm:$0xff]   ;;  %v815_v10 = vld [vmem:[#allocation5 + $0x68] sm:$0xff]  }
  0x4e   :  { %v823_v11 = vld [vmem:[#allocation2 + $0x4] ss:$8 sps:$4 sm:$0xff]   ;;  %v817_v13 = vld [vmem:[#allocation5 + $0x70] sm:$0xff]   ;;  %v819_v15 = vld [vmem:[#allocation5 + $0x78] sm:$0xff]  }
  0x4f   :  { %v816_v12 = vld [vmem:[#allocation5 + $0x28] sm:$0xff]   ;;  %336 = vmatprep.mubr.bf16.mxu0 %v823_v11  ;;  %v818_v14 = vld [vmem:[#allocation5 + $0x30] sm:$0xff]   ;;  %v820_v16 = vld [vmem:[#allocation5 + $0x38] sm:$0xff]  }
  0x50   :  { %687 = vmatpush3.bf16.msra.mxu0 %v808_v3  ;;  %v845_v17 = vld [vmem:[#allocation8] sm:$0xff]   ;;  %v846_v19 = vld [vmem:[#allocation8 + $0x8] sm:$0xff]   ;;  %v847_v21 = vld [vmem:[#allocation8 + $0x10] sm:$0xff]  }
  0x51   :  { %688 = vmatprep.subr.bf16.mxu0 %v809_v4  ;;  %v821_v18 = vld [vmem:[#allocation2] ss:$8 sps:$4 sm:$0xff]   ;;  %v824_v20 = vld [vmem:[#allocation2 + $0x14] ss:$8 sps:$4 sm:$0xff]   ;;  %764 = vmatprep.subr.bf16.mxu1 %v845_v17  ;;  %v826_v22 = vld [vmem:[#allocation2 + $0x10] ss:$8 sps:$4 sm:$0xff]  }
  0x52   :  { %765 = vmatpush3.bf16.msra.mxu1 %v845_v17  ;;  %v827_v23 = vld [vmem:[#allocation2 + $0x24] ss:$8 sps:$4 sm:$0xff]   ;;  %v829_v24 = vld [vmem:[#allocation2 + $0x20] ss:$8 sps:$4 sm:$0xff]   ;;  %v830_v25 = vld [vmem:[#allocation2 + $0x34] ss:$8 sps:$4 sm:$0xff]  }
  0x53   :  { %766 = vmatprep.subr.bf16.mxu1 %v846_v19  ;;  %v832_v26 = vld [vmem:[#allocation2 + $0x30] ss:$8 sps:$4 sm:$0xff]   ;;  %v833_v27 = vld [vmem:[#allocation2 + $0x44] ss:$8 sps:$4 sm:$0xff]   ;;  %v835_v28 = vld [vmem:[#allocation2 + $0x40] ss:$8 sps:$4 sm:$0xff]  }
  0x54   :  { %689 = vmatpush3.bf16.msra.mxu0 %v810_v5  ;;  %v836_v29 = vld [vmem:[#allocation2 + $0x54] ss:$8 sps:$4 sm:$0xff]   ;;  %v838_v30 = vld [vmem:[#allocation2 + $0x50] ss:$8 sps:$4 sm:$0xff]   ;;  %v839_v31 = vld [vmem:[#allocation2 + $0x64] ss:$8 sps:$4 sm:$0xff]  }
  0x55   :  { %690 = vmatprep.subr.bf16.mxu0 %v811_v6  ;;  %v841_v32 = vld [vmem:[#allocation2 + $0x60] ss:$8 sps:$4 sm:$0xff]   ;;  %v842_v33 = vld [vmem:[#allocation2 + $0x74] ss:$8 sps:$4 sm:$0xff]   ;;  %v844_v34 = vld [vmem:[#allocation2 + $0x70] ss:$8 sps:$4 sm:$0xff]  }
  0x56   :  { %767 = vmatpush3.bf16.msra.mxu1 %v846_v19  ;;  %v848_v35 = vld [vmem:[#allocation8 + $0x18] sm:$0xff]   ;;  %v849_v36 = vld [vmem:[#allocation8 + $0x20] sm:$0xff]   ;;  %v850_v37 = vld [vmem:[#allocation8 + $0x28] sm:$0xff]  }
  0x57   :  { %768 = vmatprep.subr.bf16.mxu1 %v847_v21  ;;  %v851_v38 = vld [vmem:[#allocation8 + $0x30] sm:$0xff]   ;;  %v852_v39 = vld [vmem:[#allocation8 + $0x38] sm:$0xff]  }
  0x58   :  { %691 = vmatpush3.bf16.msra.mxu0 %v812_v7  ;;  %v1074_v42 = vld [vmem:[#allocation7] ss:$0 sm:$0xff] }
  0x59   :  { %692 = vmatprep.subr.bf16.mxu0 %v813_v8 }
  0x5a   :  { %769 = vmatpush3.bf16.msra.mxu1 %v847_v21 }
  0x5b   :  { %770 = vmatprep.subr.bf16.mxu1 %v848_v35 }
  0x5c   :  { %693 = vmatpush3.bf16.msra.mxu0 %v814_v9 }
  0x5d   :  { %694 = vmatprep.subr.bf16.mxu0 %v815_v10 }
  0x5e   :  { %771 = vmatpush3.bf16.msra.mxu1 %v848_v35 }
  0x5f   :  { %772 = vmatprep.subr.bf16.mxu1 %v849_v36 }
  0x60   :  { %695 = vmatpush3.bf16.msra.mxu0 %v816_v12 }
  0x61   :  { %696 = vmatprep.subr.bf16.mxu0 %v817_v13 }
  0x62   :  { %773 = vmatpush3.bf16.msra.mxu1 %v849_v36 }
  0x63   :  { %774 = vmatprep.subr.bf16.mxu1 %v850_v37 }
  0x64   :  { %697 = vmatpush3.bf16.msra.mxu0 %v818_v14 }
  0x65   :  { %698 = vmatprep.subr.bf16.mxu0 %v819_v15 }
  0x66   :  { %775 = vmatpush3.bf16.msra.mxu1 %v850_v37 }
  0x67   :  { %776 = vmatprep.subr.bf16.mxu1 %v851_v38 }
  0x68   :  { %699 = vmatpush3.bf16.msra.mxu0 %v820_v16 }
  0x6a   :  { %777 = vmatpush3.bf16.msra.mxu1 %v851_v38 }
  0x6b   :  { %337 = vmatmul.mubr.bf16.vlgmr.msra.gmra.mrb[0].mxu0 %v821_v18  ;;  %778 = vmatprep.subr.bf16.mxu1 %v852_v39 }
  0x6c   :  { %344 = vmatprep.mubr.bf16.mxu0 %v824_v20 }
  0x6e   :  { %779 = vmatpush3.bf16.msra.mxu1 %v852_v39 }
  0x73   :  { %345 = vmatmul.mubr.bf16.gmra.mrb[4].mxu0 %v826_v22 }
  0x74   :  { %352 = vmatprep.mubr.bf16.mxu0 %v827_v23 }
  0x7b   :  { %353 = vmatmul.mubr.bf16.gmra.mrb[8].mxu0 %v829_v24 }
  0x7c   :  { %360 = vmatprep.mubr.bf16.mxu0 %v830_v25 }
  0x83   :  { %361 = vmatmul.mubr.bf16.gmra.mrb[12].mxu0 %v832_v26 }
  0x84   :  { %368 = vmatprep.mubr.bf16.mxu0 %v833_v27 }
  0x8b   :  { %369 = vmatmul.mubr.bf16.gmra.mrb[16].mxu0 %v835_v28 }
  0x8c   :  { %376 = vmatprep.mubr.bf16.mxu0 %v836_v29 }
  0x93   :  { %377 = vmatmul.mubr.bf16.gmra.mrb[20].mxu0 %v838_v30 }
  0x94   :  { %384 = vmatprep.mubr.bf16.mxu0 %v839_v31 }
  0x9b   :  { %385 = vmatmul.mubr.bf16.gmra.mrb[24].mxu0 %v841_v32 }
  0x9c   :  { %392 = vmatprep.mubr.bf16.mxu0 %v842_v33 }
  0xa3   :  { %393 = vmatmul.mubr.bf16.gmra.mrb[28].mxu0 %v844_v34 }
 0x13e   :  { %v700_v40 = vpop.f32.mrb[0].mxu0 }
 0x13f   :  { %v701_v41 = vpop.f32.mrb[1].mxu0 }
 0x140   :  { %v702_v43 = vadd.f32 %v701_v41, %v700_v40  ;;  %v703_v44 = vpop.f32.mrb[2].mxu0 }
 0x141   :  { %v704_v45 = vpop.f32.mrb[3].mxu0 }
 0x142   :  { %v705_v46 = vadd.f32 %v704_v45, %v703_v44  ;;  %v339_v47 = vadd.f32 %v702_v43, %v1074_v42 }
 0x144   :  { %v342_v48 = vadd.f32 %v705_v46, %v1074_v42  ;;  %v401_v50 = vmax.f32 %v339_v47, 0.0 }
 0x146   :  { %v706_v49 = vpop.f32.mrb[4].mxu0  ;;  %v402_v51 = vmax.f32 %v342_v48, 0.0 }
 0x147   :  { %v707_v52 = vpop.f32.mrb[5].mxu0 }
 0x148   :  { %v708_v53 = vadd.f32 %v707_v52, %v706_v49  ;;  %v709_v54 = vpop.f32.mrb[6].mxu0  ;;  %v417_v55 = vpack.c.bf16 %v402_v51, %v401_v50 }
 0x149   :  { %v710_v56 = vpop.f32.mrb[7].mxu0 }
 0x14a   :  { %v347_v57 = vadd.f32 %v708_v53, %v1074_v42  ;;  %v711_v58 = vadd.f32 %v710_v56, %v709_v54  ;;  %780 = vmatprep.mubr.bf16.mxu1 %v417_v55 }
 0x14c   :  { %v350_v59 = vadd.f32 %v711_v58, %v1074_v42  ;;  %v403_v60 = vmax.f32 %v347_v57, 0.0 }
 0x14e   :  { %v404_v61 = vmax.f32 %v350_v59, 0.0  ;;  %v712_v62 = vpop.f32.mrb[8].mxu0 }
 0x14f   :  { %v713_v63 = vpop.f32.mrb[9].mxu0 }
 0x150   :  { %v714_v0 = vadd.f32 %v713_v63, %v712_v62  ;;  %v715_v1 = vpop.f32.mrb[10].mxu0  ;;  %v418_v2 = vpack.c.bf16 %v404_v61, %v403_v60 }
 0x151   :  { %v716_v3 = vpop.f32.mrb[11].mxu0 }
 0x152   :  { %v355_v4 = vadd.f32 %v714_v0, %v1074_v42  ;;  %v717_v5 = vadd.f32 %v716_v3, %v715_v1  ;;  %781 = vmatmul.mubr.bf16.vlgmr.msra.gmra.mrb[0].mxu1 %v418_v2  ;;  %v675_v2 = vld [vmem:[%s1114_s4] ss:$0 sm:$0xff]  ;;  %s979_s4 = smov [#allocation10]  }
 0x153   :  { %s628_s29 = sshll.u32 %s979_s4, 4  ;;  %s629_s29 = int_to_ptr.vmem [resolvable:$true] %s628_s29 }
 0x154   :  { %v358_v6 = vadd.f32 %v717_v5, %v1074_v42  ;;  %v405_v7 = vmax.f32 %v355_v4, 0.0  ;;  %s941_s20 = scalar_lea.vmem %s629_s29, 2048  ;;  %p946_p5 = scmp.lt.s32.totalorder %s629_s29, %s629_s29 }
 0x155   :  { %p942_p4 = scmp.ne.s32.totalorder %s629_s29, %s941_s20  ;;  %p947_p6 = scmp.lt.s32.totalorder %s941_s20, %s941_s20 }
 0x156   :  { %v406_v8 = vmax.f32 %v358_v6, 0.0  ;;  %v718_v9 = vpop.f32.mrb[12].mxu0 }
 0x157   :  { %v719_v10 = vpop.f32.mrb[13].mxu0  ;;  %p948_p7 = por %p947_p6, %p946_p5 }
 0x158   :  { %v720_v11 = vadd.f32 %v719_v10, %v718_v9  ;;  %v721_v12 = vpop.f32.mrb[14].mxu0  ;;  %v419_v13 = vpack.c.bf16 %v406_v8, %v405_v7 }
 0x159   :  { %v722_v14 = vpop.f32.mrb[15].mxu0  ;;  %p949_p8 = pnand %p948_p7, %p942_p4 }
 0x15a   :  { %v363_v15 = vadd.f32 %v720_v11, %v1074_v42  ;;  %v723_v16 = vadd.f32 %v722_v14, %v721_v12  ;;  %784 = vmatprep.mubr.bf16.mxu1 %v419_v13 }
 0x15c   :  { %v366_v17 = vadd.f32 %v723_v16, %v1074_v42  ;;  %v407_v18 = vmax.f32 %v363_v15, 0.0 }
 0x15e   :  { %v408_v19 = vmax.f32 %v366_v17, 0.0  ;;  %v724_v20 = vpop.f32.mrb[16].mxu0 }
 0x15f   :  { %v725_v21 = vpop.f32.mrb[17].mxu0 }
 0x160   :  { %v726_v22 = vadd.f32 %v725_v21, %v724_v20  ;;  %v727_v23 = vpop.f32.mrb[18].mxu0  ;;  %v420_v24 = vpack.c.bf16 %v408_v19, %v407_v18 }
 0x161   :  { %v728_v25 = vpop.f32.mrb[19].mxu0 }
 0x162   :  { %v371_v26 = vadd.f32 %v726_v22, %v1074_v42  ;;  %v729_v27 = vadd.f32 %v728_v25, %v727_v23  ;;  %785 = vmatmul.mubr.bf16.gmra.mrb[4].mxu1 %v420_v24 }
 0x164   :  { %v374_v28 = vadd.f32 %v729_v27, %v1074_v42  ;;  %v409_v29 = vmax.f32 %v371_v26, 0.0 }
 0x166   :  { %v410_v30 = vmax.f32 %v374_v28, 0.0  ;;  %v730_v31 = vpop.f32.mrb[20].mxu0 }
 0x167   :  { %v731_v32 = vpop.f32.mrb[21].mxu0 }
 0x168   :  { %v732_v33 = vadd.f32 %v731_v32, %v730_v31  ;;  %v733_v34 = vpop.f32.mrb[22].mxu0  ;;  %v421_v35 = vpack.c.bf16 %v410_v30, %v409_v29 }
 0x169   :  { %v734_v36 = vpop.f32.mrb[23].mxu0 }
 0x16a   :  { %v379_v37 = vadd.f32 %v732_v33, %v1074_v42  ;;  %v735_v38 = vadd.f32 %v734_v36, %v733_v34  ;;  %788 = vmatprep.mubr.bf16.mxu1 %v421_v35 }
 0x16c   :  { %v382_v39 = vadd.f32 %v735_v38, %v1074_v42  ;;  %v411_v40 = vmax.f32 %v379_v37, 0.0 }
 0x16e   :  { %v412_v41 = vmax.f32 %v382_v39, 0.0  ;;  %v736_v43 = vpop.f32.mrb[24].mxu0 }
 0x16f   :  { %v737_v44 = vpop.f32.mrb[25].mxu0 }
 0x170   :  { %v738_v45 = vadd.f32 %v737_v44, %v736_v43  ;;  %v739_v46 = vpop.f32.mrb[26].mxu0  ;;  %v422_v47 = vpack.c.bf16 %v412_v41, %v411_v40 }
 0x171   :  { %v740_v48 = vpop.f32.mrb[27].mxu0 }
 0x172   :  { %v387_v49 = vadd.f32 %v738_v45, %v1074_v42  ;;  %v741_v50 = vadd.f32 %v740_v48, %v739_v46  ;;  %789 = vmatmul.mubr.bf16.gmra.mrb[8].mxu1 %v422_v47 }
 0x174   :  { %v390_v51 = vadd.f32 %v741_v50, %v1074_v42  ;;  %v413_v52 = vmax.f32 %v387_v49, 0.0 }
 0x176   :  { %v414_v53 = vmax.f32 %v390_v51, 0.0  ;;  %v742_v54 = vpop.f32.mrb[28].mxu0 }
 0x177   :  { %v743_v55 = vpop.f32.mrb[29].mxu0 }
 0x178   :  { %v744_v56 = vadd.f32 %v743_v55, %v742_v54  ;;  %v745_v57 = vpop.f32.mrb[30].mxu0  ;;  %v423_v58 = vpack.c.bf16 %v414_v53, %v413_v52 }
 0x179   :  { %v746_v59 = vpop.f32.mrb[31].mxu0 }
 0x17a   :  { %v395_v60 = vadd.f32 %v744_v56, %v1074_v42  ;;  %v747_v61 = vadd.f32 %v746_v59, %v745_v57  ;;  %792 = vmatprep.mubr.bf16.mxu1 %v423_v58 }
 0x17c   :  { %v398_v62 = vadd.f32 %v747_v61, %v1074_v42  ;;  %v415_v63 = vmax.f32 %v395_v60, 0.0 }
 0x17e   :  { %v416_v0 = vmax.f32 %v398_v62, 0.0 }
 0x180   :  { %v424_v1 = vpack.c.bf16 %v416_v0, %v415_v63 }
 0x182   :  { %793 = vmatmul.mubr.bf16.gmra.mrb[12].mxu1 %v424_v1 }
 0x225   :  { %v782_v3 = vpop.f32.mrb[0].mxu1 }
 0x226   :  { %v537_v4 = vadd.f32 %v782_v3, %v675_v2  ;;  %v528_v5 = vpop.f32.mrb[1].mxu1 }
 0x227   :  { %v529_v6 = vadd.f32 %v675_v2, %v528_v5  ;;  %v783_v7 = vpop.f32.mrb[2].mxu1 }
 0x228   :  { %v593_v8 = vmax.f32 %v537_v4, 0.0  ;;  %v540_v9 = vadd.f32 %v783_v7, %v675_v2  ;;  %v531_v10 = vpop.f32.mrb[3].mxu1 }
 0x229   :  { %v591_v11 = vmax.f32 %v529_v6, 0.0  ;;  %v532_v12 = vadd.f32 %v675_v2, %v531_v10 }
 0x22a   :  { %609 = vst [vmem:[#allocation10 + $0x10] sm:$0xff] %v593_v8  ;;  %v594_v42 = vmax.f32 %v540_v9, 0.0 }
 0x22b   :  { %607 = vst [vmem:[#allocation10] sm:$0xff] %v591_v11  ;;  %v592_v13 = vmax.f32 %v532_v12, 0.0 }
 0x22c   :  { %610 = vst [vmem:[#allocation10 + $0x18] sm:$0xff] %v594_v42 }
 0x22d   :  { %608 = vst [vmem:[#allocation10 + $0x8] sm:$0xff] %v592_v13 }
 0x235   :  { %v786_v14 = vpop.f32.mrb[4].mxu1 }
 0x236   :  { %v553_v15 = vadd.f32 %v786_v14, %v675_v2  ;;  %v544_v16 = vpop.f32.mrb[5].mxu1 }
 0x237   :  { %v545_v17 = vadd.f32 %v675_v2, %v544_v16  ;;  %v787_v18 = vpop.f32.mrb[6].mxu1 }
 0x238   :  { %v597_v19 = vmax.f32 %v553_v15, 0.0  ;;  %v556_v20 = vadd.f32 %v787_v18, %v675_v2  ;;  %v547_v21 = vpop.f32.mrb[7].mxu1 }
 0x239   :  { %v595_v22 = vmax.f32 %v545_v17, 0.0  ;;  %v548_v23 = vadd.f32 %v675_v2, %v547_v21 }
 0x23a   :  { %613 = vst [vmem:[#allocation10 + $0x30] sm:$0xff] %v597_v19  ;;  %v598_v24 = vmax.f32 %v556_v20, 0.0 }
 0x23b   :  { %611 = vst [vmem:[#allocation10 + $0x20] sm:$0xff] %v595_v22  ;;  %v596_v25 = vmax.f32 %v548_v23, 0.0 }
 0x23c   :  { %614 = vst [vmem:[#allocation10 + $0x38] sm:$0xff] %v598_v24 }
 0x23d   :  { %612 = vst [vmem:[#allocation10 + $0x28] sm:$0xff] %v596_v25 }
 0x245   :  { %v790_v26 = vpop.f32.mrb[8].mxu1 }
 0x246   :  { %v569_v27 = vadd.f32 %v790_v26, %v675_v2  ;;  %v560_v28 = vpop.f32.mrb[9].mxu1 }
 0x247   :  { %v561_v29 = vadd.f32 %v675_v2, %v560_v28  ;;  %v791_v30 = vpop.f32.mrb[10].mxu1 }
 0x248   :  { %v601_v31 = vmax.f32 %v569_v27, 0.0  ;;  %v572_v32 = vadd.f32 %v791_v30, %v675_v2  ;;  %v563_v33 = vpop.f32.mrb[11].mxu1 }
 0x249   :  { %v599_v34 = vmax.f32 %v561_v29, 0.0  ;;  %v564_v35 = vadd.f32 %v675_v2, %v563_v33 }
 0x24a   :  { %617 = vst [vmem:[#allocation10 + $0x50] sm:$0xff] %v601_v31  ;;  %v602_v36 = vmax.f32 %v572_v32, 0.0 }
 0x24b   :  { %615 = vst [vmem:[#allocation10 + $0x40] sm:$0xff] %v599_v34  ;;  %v600_v37 = vmax.f32 %v564_v35, 0.0 }
 0x24c   :  { %618 = vst [vmem:[#allocation10 + $0x58] sm:$0xff] %v602_v36 }
 0x24d   :  { %616 = vst [vmem:[#allocation10 + $0x48] sm:$0xff] %v600_v37 }
 0x255   :  { %v794_v38 = vpop.f32.mrb[12].mxu1 }
 0x256   :  { %v585_v39 = vadd.f32 %v794_v38, %v675_v2  ;;  %v576_v40 = vpop.f32.mrb[13].mxu1 }
 0x257   :  { %v577_v41 = vadd.f32 %v675_v2, %v576_v40  ;;  %v795_v43 = vpop.f32.mrb[14].mxu1 }
 0x258   :  { %v605_v44 = vmax.f32 %v585_v39, 0.0  ;;  %v588_v45 = vadd.f32 %v795_v43, %v675_v2  ;;  %v579_v46 = vpop.f32.mrb[15].mxu1 }
 0x259   :  { %v603_v47 = vmax.f32 %v577_v41, 0.0  ;;  %v580_v48 = vadd.f32 %v675_v2, %v579_v46 }
 0x25a   :  { %621 = vst [vmem:[#allocation10 + $0x70] sm:$0xff] %v605_v44  ;;  %v606_v49 = vmax.f32 %v588_v45, 0.0 }
 0x25b   :  { %619 = vst [vmem:[#allocation10 + $0x60] sm:$0xff] %v603_v47  ;;  %v604_v50 = vmax.f32 %v580_v48, 0.0 }
 0x25c   :  { %622 = vst [vmem:[#allocation10 + $0x78] sm:$0xff] %v606_v49 }
 0x25d   :  { %620 = vst [vmem:[#allocation10 + $0x68] sm:$0xff] %v604_v50 }
 0x25e   :  { %952 = shalt.err (!%p949_p8)
}
 0x25f   :  { %s953_s23 = scalar_lea.hbm %s1115_s5, 2048 }
 0x260   :  { %p954_p9 = scmp.ne.s32.totalorder %s1115_s5, %s953_s23  ;;  %p957_p10 = scmp.lt.u32.totalorder %s953_s23, %s1115_s5 }
 0x262   :  { %p959_p11 = pnand %p957_p10, %p954_p9 }
 0x264   :  { %962 = shalt.err (!%p959_p11)
}
 0x265   :  { %634 = dma.vmem_to_hbm [thread:$0]  %s629_s29, 2048, %s1115_s5, [#allocation4], %s975_s1, %s975_s1, %s976_s17  }
 0x266   :  { %969 = dma.done.wait [#allocation4], 2048  }
 0x267   :  { %970 = vsyncadd [#allocation4], 4294965248 }
 0x268   :  { %638 = vsyncpa [#allocation3], 1 }
 0x269   :  { %639 = vsyncpa [#allocation6], 1 }
 0x26a   :  { %640 = vsyncpa [#allocation9], 1 }
 0x26b   :  { %641 = vsyncpa [#allocation4], 1 }

</bundles_post_ra>
